<compile_context>
chip_gen: v7x
topology: tpu7x:2x2x1
jax: 0.10.0
libtpu: 0.0.40
codegen_flags: <defaults>
</compile_context>

<pallas_src>
import functools

import jax
import jax.numpy as jnp
from jax.experimental import pallas as pl
from jax.experimental.pallas import tpu as pltpu


# --------------------------------------------------------------------------
# banded GEMM weights: conv W taps + 'same' zero pad + W-axis avg-pool folded
# --------------------------------------------------------------------------
def _banded_pooled_weights(w_hwio, w_in, pool, dtype):
    """Build B with

        B[dh*W*Cin + p*Cin + c, u*Cout + o]
            = (1/pool^2) * w[dh, (p // pool) - u + pad, c, o]   (0 if out of band)

    so that, with lhs row y holding [rows[y-1] | rows[y] | rows[y+1]] (rows =
    unscaled `pool`-row group sums of the raw image, zero rows at the borders),
    `lhs @ B` equals conv('same', stride 1) applied to the `pool x pool`
    average-pooled image.  pool=1 gives the plain (pad-folded) convolution.
    """
    KH, KW, Cin, Cout = w_hwio.shape
    pad = (KW - 1) // 2
    w_out = w_in // pool
    p = jnp.arange(w_in)
    u = jnp.arange(w_out)
    dw = p[:, None] // pool - u[None, :] + pad            # (w_in, w_out)
    valid = (dw >= 0) & (dw < KW)
    dw_c = jnp.clip(dw, 0, KW - 1)
    band = w_hwio[:, dw_c, :, :]                          # (KH, w_in, w_out, Cin, Cout)
    band = jnp.where(valid[None, :, :, None, None], band, 0.0)
    band = band / float(pool * pool)
    band = jnp.transpose(band, (0, 1, 3, 2, 4))           # (KH, w_in, Cin, w_out, Cout)
    return band.reshape(KH * w_in * Cin, w_out * Cout).astype(dtype)


def _default_batch_tile(n):
    """Largest divisor of n giving >= 2 grid steps (keeps both v7x TCs busy)."""
    if n <= 1:
        return 1
    target = max(1, n // 2)
    for bt in range(target, 0, -1):
        if n % bt == 0:
            return bt
    return 1


# --------------------------------------------------------------------------
# fused kernel: row-group sums -> tap-stacked LHS -> one banded GEMM / branch
# --------------------------------------------------------------------------
def _first_octave_kernel(x_ref, bh_ref, bl_ref, oh_ref, ol_ref,
                         lhs_h_ref, lhs_l_ref, *, b_tile, kh, w, cin, rh, rl):
    # x_ref  : (b_tile, H, W*Cin)               activations, compute dtype
    # bh_ref : (KH*W*Cin, We*Ch)                banded h2h weights
    # bl_ref : (KH*W*Cin, Wl*Cl)                banded h2l weights
    # oh_ref : (1, b_tile*He, We*Ch)            X_h (batch stacked along M)
    # ol_ref : (1, b_tile*Hl, Wl*Cl)            X_l
    # lhs_*  : VMEM scratch, tap-stacked GEMM LHS
    pad = (kh - 1) // 2
    wc = w * cin
    cdt = x_ref.dtype
    h = x_ref.shape[1]
    n_rows_h = h // rh                         # He rows per image (h2h branch)
    n_rows_l = h // rl                         # Hl rows per image (h2l branch)

    def scatter_taps(lhs_ref, rows, base, r):
        # Write the KH row-shifted copies of `rows` ((r, wc)) into the tap
        # chunks of lhs_ref[base:base+r, :]; out-of-range rows are zero.
        # Every (row, chunk) cell is written every step -> no stale state.
        for dh in range(kh):
            off = dh - pad
            dst_lo = max(0, -off)
            src_lo = max(0, off)
            n = r - abs(off)
            c0 = dh * wc
            if dst_lo > 0:                     # top halo row(s): zeros
                lhs_ref[base:base + dst_lo, c0:c0 + wc] = jnp.zeros(
                    (dst_lo, wc), rows.dtype)
            lhs_ref[base + dst_lo:base + dst_lo + n, c0:c0 + wc] = \
                rows[src_lo:src_lo + n]
            if dst_lo + n < r:                 # bottom halo row(s): zeros
                lhs_ref[base + dst_lo + n:base + r, c0:c0 + wc] = jnp.zeros(
                    (r - dst_lo - n, wc), rows.dtype)

    for b in range(b_tile):
        xb = x_ref[b]                                        # (H, W*Cin)

        # h2h rows: raw rows (stride 1) or stride-2 pre-pool row-pair sums.
        if rh == 1:
            rows_h = xb
        else:
            xg = xb.reshape(n_rows_h, rh, wc).astype(jnp.float32)
            acc = xg[:, 0, :]
            for j in range(1, rh):
                acc = acc + xg[:, j, :]
            rows_h = acc.astype(cdt)
        scatter_taps(lhs_h_ref, rows_h, b * n_rows_h, n_rows_h)

        # h2l rows: rl-row group sums (pool W axis + scale live in bl_ref).
        xg = xb.reshape(n_rows_l, rl, wc).astype(jnp.float32)
        acc = xg[:, 0, :]
        for j in range(1, rl):
            acc = acc + xg[:, j, :]
        rows_l = acc.astype(cdt)
        scatter_taps(lhs_l_ref, rows_l, b * n_rows_l, n_rows_l)

    # One MXU GEMM per branch over the whole batch tile (taps folded into K,
    # W pad + pool folded into the weights), f32 accumulation.
    oh_ref[0] = jnp.dot(lhs_h_ref[...], bh_ref[...],
                        preferred_element_type=jnp.float32).astype(oh_ref.dtype)
    ol_ref[0] = jnp.dot(lhs_l_ref[...], bl_ref[...],
                        preferred_element_type=jnp.float32).astype(ol_ref.dtype)


# --------------------------------------------------------------------------
# FirstOctaveConv.forward
# --------------------------------------------------------------------------
def first_octave_conv(x_nchw, w_h2h_oihw, w_h2l_oihw, *, stride=1, padding=1,
                      compute_dtype=jnp.bfloat16, out_dtype=jnp.float32,
                      batch_tile=None):
    """x: NCHW f32; weights: OIHW (PyTorch convention), bias=False.

    Returns (X_h, X_l) in NCHW, matching FirstOctaveConv.forward.
    """
    N, Cin, H, W = x_nchw.shape
    Ch, cin_h, KH, KW = w_h2h_oihw.shape
    Cl, cin_l, kh2, kw2 = w_h2l_oihw.shape
    assert cin_h == Cin and cin_l == Cin and (KH, KW) == (kh2, kw2)
    assert 2 * padding == KH - 1 == KW - 1, "kernel assumes 'same' convolution"
    assert stride in (1, 2)
    # PyTorch AvgPool2d(2,2) floors odd sizes; we require even sizes.
    assert H % (2 * stride) == 0 and W % (2 * stride) == 0

    rh = stride                       # raw rows per h2h GEMM row (1 or 2)
    rl = 2 * stride                   # raw rows per h2l GEMM row (2 or 4)
    He, We = H // rh, W // rh
    Hl, Wl = H // rl, W // rl

    if batch_tile is None:
        batch_tile = _default_batch_tile(N)
    assert N % batch_tile == 0
    G = N // batch_tile
    WC = W * Cin
    Mh = batch_tile * He
    Ml = batch_tile * Hl

    # layout plumbing: NCHW -> (N, H, W*Cin) channel-last-flattened view.
    x2d = jnp.transpose(x_nchw, (0, 2, 3, 1)).reshape(N, H, WC)
    x2d = x2d.astype(compute_dtype)

    # banded GEMM weights (OIHW -> HWIO -> tap/pad/pool-folded band).
    w_h2h_hwio = jnp.transpose(w_h2h_oihw, (2, 3, 1, 0))
    w_h2l_hwio = jnp.transpose(w_h2l_oihw, (2, 3, 1, 0))
    bh = _banded_pooled_weights(w_h2h_hwio, W, rh, compute_dtype)  # (KH*WC, We*Ch)
    bl = _banded_pooled_weights(w_h2l_hwio, W, rl, compute_dtype)  # (KH*WC, Wl*Cl)

    kernel = functools.partial(_first_octave_kernel, b_tile=batch_tile,
                               kh=KH, w=W, cin=Cin, rh=rh, rl=rl)

    oh, ol = pl.pallas_call(
        kernel,
        out_shape=(jax.ShapeDtypeStruct((G, Mh, We * Ch), out_dtype),
                   jax.ShapeDtypeStruct((G, Ml, Wl * Cl), out_dtype)),
        grid=(G,),
        in_specs=[
            pl.BlockSpec((batch_tile, H, WC), lambda g: (g, 0, 0)),
            pl.BlockSpec((KH * WC, We * Ch), lambda g: (0, 0)),
            pl.BlockSpec((KH * WC, Wl * Cl), lambda g: (0, 0)),
        ],
        out_specs=(
            pl.BlockSpec((1, Mh, We * Ch), lambda g: (g, 0, 0)),
            pl.BlockSpec((1, Ml, Wl * Cl), lambda g: (g, 0, 0)),
        ),
        scratch_shapes=[
            pltpu.VMEM((Mh, KH * WC), compute_dtype),   # tap-stacked h2h LHS
            pltpu.VMEM((Ml, KH * WC), compute_dtype),   # tap-stacked h2l LHS
        ],
        compiler_params=pltpu.CompilerParams(
            dimension_semantics=("parallel",)),
    )(x2d, bh, bl)

    # (G, batch_tile*He, We*Ch) and (N, He, We, Ch) share the same row-major
    # bytes; only the final NCHW transpose is a real layout change.
    x_h = jnp.transpose(oh.reshape(N, He, We, Ch), (0, 3, 1, 2))
    x_l = jnp.transpose(ol.reshape(N, Hl, Wl, Cl), (0, 3, 1, 2))
    return x_h, x_l


# --------------------------------------------------------------------------
# Pure-JAX reference (for correctness check)
# --------------------------------------------------------------------------
def _ref_first_octave_conv(x, w_h2h, w_h2l, stride=1):
    def conv(inp, w):
        return jax.lax.conv_general_dilated(
            inp, w, window_strides=(1, 1), padding=((1, 1), (1, 1)),
            dimension_numbers=("NCHW", "OIHW", "NCHW"))

    def pool(inp):
        s = jax.lax.reduce_window(inp, 0.0, jax.lax.add,
                                  (1, 1, 2, 2), (1, 1, 2, 2), "VALID")
        return s * 0.25

    if stride == 2:
        x = pool(x)
    x_h2l = pool(x)
    return conv(x, w_h2h), conv(x_h2l, w_h2l)


if __name__ == "__main__":
    # Module config: in_channels=4, out_channels=8, kernel_size=(3,3), alpha=0.5
    #   h2h: Conv2d(4, 8 - int(0.5*8)=4, 3, padding=1, bias=False) -> (4,4,3,3)
    #   h2l: Conv2d(4, int(0.5*8)=4,     3, padding=1, bias=False) -> (4,4,3,3)
    N, Cin, H, W = 2, 4, 16, 16
    Cout, alpha = 8, 0.5
    c_low = int(alpha * Cout)
    c_high = Cout - c_low

    key = jax.random.PRNGKey(0)
    kx, kh, kl = jax.random.split(key, 3)
    x = jax.random.normal(kx, (N, Cin, H, W), dtype=jnp.float32)
    w_h2h = 0.1 * jax.random.normal(kh, (c_high, Cin, 3, 3), dtype=jnp.float32)
    w_h2l = 0.1 * jax.random.normal(kl, (c_low, Cin, 3, 3), dtype=jnp.float32)

    ref_h, ref_l = _ref_first_octave_conv(x, w_h2h, w_h2l)

    # f32 compute, default batch tiling (2 grid steps -> both v7x TCs busy).
    xh, xl = first_octave_conv(x, w_h2h, w_h2l, compute_dtype=jnp.float32)
    jax.block_until_ready((xh, xl))
    assert xh.shape == (N, c_high, H, W)
    assert xl.shape == (N, c_low, H // 2, W // 2)
    assert jnp.allclose(xh, ref_h, atol=1e-4, rtol=1e-4)
    assert jnp.allclose(xl, ref_l, atol=1e-4, rtol=1e-4)

    # f32 compute, whole batch folded into the GEMM M dimension (1 grid step).
    xhb, xlb = first_octave_conv(x, w_h2h, w_h2l, compute_dtype=jnp.float32,
                                 batch_tile=N)
    jax.block_until_ready((xhb, xlb))
    assert jnp.allclose(xhb, ref_h, atol=1e-4, rtol=1e-4)
    assert jnp.allclose(xlb, ref_l, atol=1e-4, rtol=1e-4)

    # bf16 MXU path (default compute dtype): bf16-precision tolerance.
    xh16, xl16 = first_octave_conv(x, w_h2h, w_h2l)
    jax.block_until_ready((xh16, xl16))
    assert jnp.allclose(xh16, ref_h, atol=5e-2, rtol=5e-2)
    assert jnp.allclose(xl16, ref_l, atol=5e-2, rtol=5e-2)

    # stride == 2 path (pre-pool fused; its W axis folded into the weights).
    ref_h2, ref_l2 = _ref_first_octave_conv(x, w_h2h, w_h2l, stride=2)
    xh2, xl2 = first_octave_conv(x, w_h2h, w_h2l, stride=2,
                                 compute_dtype=jnp.float32)
    jax.block_until_ready((xh2, xl2))
    assert xh2.shape == (N, c_high, H // 2, W // 2)
    assert xl2.shape == (N, c_low, H // 4, W // 4)
    assert jnp.allclose(xh2, ref_h2, atol=1e-4, rtol=1e-4)
    assert jnp.allclose(xl2, ref_l2, atol=1e-4, rtol=1e-4)

    print("KERNEL_OK")
</pallas_src>

<mosaic_0001>
module attributes {stable_mosaic.version = 11 : i64} {
  func.func @_first_octave_kernel(%arg0: i32, %arg1: memref<1x16x64xf32, #tpu.memory_space<vmem>>, %arg2: memref<192x64xf32, #tpu.memory_space<vmem>>, %arg3: memref<192x32xf32, #tpu.memory_space<vmem>>, %arg4: memref<1x16x64xf32, #tpu.memory_space<vmem>>, %arg5: memref<1x8x32xf32, #tpu.memory_space<vmem>>, %arg6: memref<16x192xf32, #tpu.memory_space<vmem>>, %arg7: memref<8x192xf32, #tpu.memory_space<vmem>>) attributes {dimension_semantics = [#tpu.dimension_semantics<parallel>], iteration_bounds = array<i64: 2>, scalar_prefetch = 0 : i64, scratch_operands = 2 : i64, tpu.core_type = #tpu.core_type<tc>, window_params = [{transform_indices = @transform_0, window_bounds = array<i64: 1, 16, 64>}, {pipeline_mode = #tpu.pipeline_mode<synchronous>, transform_indices = @transform_1, window_bounds = array<i64: 192, 64>}, {pipeline_mode = #tpu.pipeline_mode<synchronous>, transform_indices = @transform_2, window_bounds = array<i64: 192, 32>}, {transform_indices = @transform_3, window_bounds = array<i64: 1, 16, 64>}, {transform_indices = @transform_4, window_bounds = array<i64: 1, 8, 32>}]} {
    %c0 = arith.constant 0 : index
    %c0_0 = arith.constant 0 : index
    %c0_1 = arith.constant 0 : index
    %0 = vector.load %arg1[%c0, %c0_0, %c0_1] : memref<1x16x64xf32, #tpu.memory_space<vmem>>, vector<1x16x64xf32>
    %1 = vector.shape_cast %0 : vector<1x16x64xf32> to vector<16x64xf32>
    %cst = arith.constant 0.000000e+00 : f32
    %2 = vector.broadcast %cst : f32 to vector<1x64xf32>
    %c0_2 = arith.constant 0 : index
    %c0_3 = arith.constant 0 : index
    %3 = vector.load %arg6[%c0_2, %c0_3] : memref<16x192xf32, #tpu.memory_space<vmem>>, vector<1x64xf32>
    tpu.vector_store %arg6[%c0_2, %c0_3], %2 {strides = array<i32>} : memref<16x192xf32, #tpu.memory_space<vmem>>, vector<1x64xf32>,
    %4 = vector.extract_strided_slice %1 {offsets = [0, 0], sizes = [15, 64], strides = [1, 1]} : vector<16x64xf32> to vector<15x64xf32>
    %c1 = arith.constant 1 : index
    %c0_4 = arith.constant 0 : index
    %5 = vector.load %arg6[%c1, %c0_4] : memref<16x192xf32, #tpu.memory_space<vmem>>, vector<15x64xf32>
    tpu.vector_store %arg6[%c1, %c0_4], %4 {strides = array<i32>} : memref<16x192xf32, #tpu.memory_space<vmem>>, vector<15x64xf32>,
    %c0_5 = arith.constant 0 : index
    %c64 = arith.constant 64 : index
    %6 = vector.load %arg6[%c0_5, %c64] : memref<16x192xf32, #tpu.memory_space<vmem>>, vector<16x64xf32>
    tpu.vector_store %arg6[%c0_5, %c64], %1 {strides = array<i32>} : memref<16x192xf32, #tpu.memory_space<vmem>>, vector<16x64xf32>,
    %7 = vector.extract_strided_slice %1 {offsets = [1, 0], sizes = [15, 64], strides = [1, 1]} : vector<16x64xf32> to vector<15x64xf32>
    %c0_6 = arith.constant 0 : index
    %c128 = arith.constant 128 : index
    %8 = vector.load %arg6[%c0_6, %c128] : memref<16x192xf32, #tpu.memory_space<vmem>>, vector<15x64xf32>
    tpu.vector_store %arg6[%c0_6, %c128], %7 {strides = array<i32>} : memref<16x192xf32, #tpu.memory_space<vmem>>, vector<15x64xf32>,
    %cst_7 = arith.constant 0.000000e+00 : f32
    %9 = vector.broadcast %cst_7 : f32 to vector<1x64xf32>
    %c15 = arith.constant 15 : index
    %c128_8 = arith.constant 128 : index
    %10 = vector.load %arg6[%c15, %c128_8] : memref<16x192xf32, #tpu.memory_space<vmem>>, vector<1x64xf32>
    tpu.vector_store %arg6[%c15, %c128_8], %9 {strides = array<i32>} : memref<16x192xf32, #tpu.memory_space<vmem>>, vector<1x64xf32>,
    %11 = vector.shape_cast %1 : vector<16x64xf32> to vector<8x2x64xf32>
    %12 = vector.extract_strided_slice %11 {offsets = [0, 0, 0], sizes = [8, 1, 64], strides = [1, 1, 1]} : vector<8x2x64xf32> to vector<8x1x64xf32>
    %13 = vector.shape_cast %12 : vector<8x1x64xf32> to vector<8x64xf32>
    %14 = vector.extract_strided_slice %11 {offsets = [0, 1, 0], sizes = [8, 1, 64], strides = [1, 1, 1]} : vector<8x2x64xf32> to vector<8x1x64xf32>
    %15 = vector.shape_cast %14 : vector<8x1x64xf32> to vector<8x64xf32>
    %16 = arith.addf %13, %15 : vector<8x64xf32>
    %cst_9 = arith.constant 0.000000e+00 : f32
    %17 = vector.broadcast %cst_9 : f32 to vector<1x64xf32>
    %c0_10 = arith.constant 0 : index
    %c0_11 = arith.constant 0 : index
    %18 = vector.load %arg7[%c0_10, %c0_11] : memref<8x192xf32, #tpu.memory_space<vmem>>, vector<1x64xf32>
    tpu.vector_store %arg7[%c0_10, %c0_11], %17 {strides = array<i32>} : memref<8x192xf32, #tpu.memory_space<vmem>>, vector<1x64xf32>,
    %19 = vector.extract_strided_slice %16 {offsets = [0, 0], sizes = [7, 64], strides = [1, 1]} : vector<8x64xf32> to vector<7x64xf32>
    %c1_12 = arith.constant 1 : index
    %c0_13 = arith.constant 0 : index
    %20 = vector.load %arg7[%c1_12, %c0_13] : memref<8x192xf32, #tpu.memory_space<vmem>>, vector<7x64xf32>
    tpu.vector_store %arg7[%c1_12, %c0_13], %19 {strides = array<i32>} : memref<8x192xf32, #tpu.memory_space<vmem>>, vector<7x64xf32>,
    %c0_14 = arith.constant 0 : index
    %c64_15 = arith.constant 64 : index
    %21 = vector.load %arg7[%c0_14, %c64_15] : memref<8x192xf32, #tpu.memory_space<vmem>>, vector<8x64xf32>
    tpu.vector_store %arg7[%c0_14, %c64_15], %16 {strides = array<i32>} : memref<8x192xf32, #tpu.memory_space<vmem>>, vector<8x64xf32>,
    %22 = vector.extract_strided_slice %16 {offsets = [1, 0], sizes = [7, 64], strides = [1, 1]} : vector<8x64xf32> to vector<7x64xf32>
    %c0_16 = arith.constant 0 : index
    %c128_17 = arith.constant 128 : index
    %23 = vector.load %arg7[%c0_16, %c128_17] : memref<8x192xf32, #tpu.memory_space<vmem>>, vector<7x64xf32>
    tpu.vector_store %arg7[%c0_16, %c128_17], %22 {strides = array<i32>} : memref<8x192xf32, #tpu.memory_space<vmem>>, vector<7x64xf32>,
    %cst_18 = arith.constant 0.000000e+00 : f32
    %24 = vector.broadcast %cst_18 : f32 to vector<1x64xf32>
    %c7 = arith.constant 7 : index
    %c128_19 = arith.constant 128 : index
    %25 = vector.load %arg7[%c7, %c128_19] : memref<8x192xf32, #tpu.memory_space<vmem>>, vector<1x64xf32>
    tpu.vector_store %arg7[%c7, %c128_19], %24 {strides = array<i32>} : memref<8x192xf32, #tpu.memory_space<vmem>>, vector<1x64xf32>,
    %c0_20 = arith.constant 0 : index
    %c0_21 = arith.constant 0 : index
    %26 = vector.load %arg6[%c0_20, %c0_21] : memref<16x192xf32, #tpu.memory_space<vmem>>, vector<16x192xf32>
    %c0_22 = arith.constant 0 : index
    %c0_23 = arith.constant 0 : index
    %27 = vector.load %arg2[%c0_22, %c0_23] : memref<192x64xf32, #tpu.memory_space<vmem>>, vector<192x64xf32>
    %cst_24 = arith.constant dense<0.000000e+00> : vector<16x64xf32>
    %28 = tpu.matmul %26, %27, %cst_24 {dimension_numbers = #tpu.dot_dimension_numbers<[1], [0], [0], [1], [0, 0, 1, 1], [], []>} : vector<16x192xf32>, vector<192x64xf32>, vector<16x64xf32> -> vector<16x64xf32>
    %c0_25 = arith.constant 0 : index
    %c0_26 = arith.constant 0 : index
    %c0_27 = arith.constant 0 : index
    %29 = vector.load %arg4[%c0_25, %c0_26, %c0_27] : memref<1x16x64xf32, #tpu.memory_space<vmem>>, vector<1x16x64xf32>
    %30 = vector.shape_cast %29 : vector<1x16x64xf32> to vector<16x64xf32>
    %31 = vector.shape_cast %28 : vector<16x64xf32> to vector<1x16x64xf32>
    tpu.vector_store %arg4[%c0_25, %c0_26, %c0_27], %31 {strides = array<i32>} : memref<1x16x64xf32, #tpu.memory_space<vmem>>, vector<1x16x64xf32>,
    %c0_28 = arith.constant 0 : index
    %c0_29 = arith.constant 0 : index
    %32 = vector.load %arg7[%c0_28, %c0_29] : memref<8x192xf32, #tpu.memory_space<vmem>>, vector<8x192xf32>
    %c0_30 = arith.constant 0 : index
    %c0_31 = arith.constant 0 : index
    %33 = vector.load %arg3[%c0_30, %c0_31] : memref<192x32xf32, #tpu.memory_space<vmem>>, vector<192x32xf32>
    %cst_32 = arith.constant dense<0.000000e+00> : vector<8x32xf32>
    %34 = tpu.matmul %32, %33, %cst_32 {dimension_numbers = #tpu.dot_dimension_numbers<[1], [0], [0], [1], [0, 0, 1, 1], [], []>} : vector<8x192xf32>, vector<192x32xf32>, vector<8x32xf32> -> vector<8x32xf32>
    %c0_33 = arith.constant 0 : index
    %c0_34 = arith.constant 0 : index
    %c0_35 = arith.constant 0 : index
    %35 = vector.load %arg5[%c0_33, %c0_34, %c0_35] : memref<1x8x32xf32, #tpu.memory_space<vmem>>, vector<1x8x32xf32>
    %36 = vector.shape_cast %35 : vector<1x8x32xf32> to vector<8x32xf32>
    %37 = vector.shape_cast %34 : vector<8x32xf32> to vector<1x8x32xf32>
    tpu.vector_store %arg5[%c0_33, %c0_34, %c0_35], %37 {strides = array<i32>} : memref<1x8x32xf32, #tpu.memory_space<vmem>>, vector<1x8x32xf32>,
    return
  }
  func.func @transform_0(%arg0: i32) -> (i32, i32, i32) {
    %c0_i32 = arith.constant 0 : i32
    %c0_i32_0 = arith.constant 0 : i32
    %c0_i32_1 = arith.constant 0 : i32
    return %arg0, %c0_i32, %c0_i32_0 : i32, i32, i32
  }
  func.func @transform_1(%arg0: i32) -> (i32, i32) {
    %c0_i32 = arith.constant 0 : i32
    %c0_i32_0 = arith.constant 0 : i32
    %c0_i32_1 = arith.constant 0 : i32
    return %c0_i32, %c0_i32_0 : i32, i32
  }
  func.func @transform_2(%arg0: i32) -> (i32, i32) {
    %c0_i32 = arith.constant 0 : i32
    %c0_i32_0 = arith.constant 0 : i32
    %c0_i32_1 = arith.constant 0 : i32
    return %c0_i32, %c0_i32_0 : i32, i32
  }
  func.func @transform_3(%arg0: i32) -> (i32, i32, i32) {
    %c0_i32 = arith.constant 0 : i32
    %c0_i32_0 = arith.constant 0 : i32
    %c0_i32_1 = arith.constant 0 : i32
    return %arg0, %c0_i32, %c0_i32_0 : i32, i32, i32
  }
  func.func @transform_4(%arg0: i32) -> (i32, i32, i32) {
    %c0_i32 = arith.constant 0 : i32
    %c0_i32_0 = arith.constant 0 : i32
    %c0_i32_1 = arith.constant 0 : i32
    return %arg0, %c0_i32, %c0_i32_0 : i32, i32, i32
  }
}

</mosaic_0001>

<bundles_post_ra>
// kernel: tpu_custom_call.1
= control target key start
LH: loop header
LB: loop body
LE: loop exit
PB: predicated region body
PF: predicated region fallthrough
CT: control target
= control target key end

     0   :  { %10 = vsyncpa [#allocation5], 0  ;;  %s1417_s0 = inlined_call_operand.vmem [shape: f32[2,16,64], index: 0, kind: input, shape index: {}]   ;;  %s1418_s1 = inlined_call_operand.vmem [shape: f32[192,64], index: 1, kind: input, shape index: {}]   ;;  %s1419_s2 = inlined_call_operand.vmem [shape: f32[192,32], index: 2, kind: input, shape index: {}]   ;;  %s1420_s3 = inlined_call_operand.hbm [shape: f32[2,16,64], index: 3, kind: output, shape index: {0}]   ;;  %s1421_s4 = inlined_call_operand.hbm [shape: f32[2,8,32], index: 4, kind: output, shape index: {1}]  }
   0x1   :  { %12 = vsyncpa [#allocation5 + $0x1], 0 }
   0x2   :  { %13 = vsyncpa [#allocation7], 0 }
   0x3   :  { %15 = vsyncpa [#allocation7 + $0x1], 0  ;;  %s1011_s15 = smov 0   ;;  %s1013_s16 = smov 0  }
   0x4   :  { %s1015_s17 = smov 0   ;;  %s1017_s18 = smov 0  }
   0x5 LB: > { %s1032_s19 = sadd.s32 4294967295, %s976_s18   ;;  %s730_s20 = sadd.s32 4294967294, %s976_s18   ;;  %s976_s18 = sphi %s1017_s18, %s1427_s18   ;;  %s972_s17 = sphi %s1015_s17, %s1426_s17   ;;  %s968_s16 = sphi %s1013_s16, %s1425_s16   ;;  %s964_s15 = sphi %s1011_s15, %s1424_s15  }
   0x6   : > { %s1036_s21 = sadd.s32 1, %s976_s18   ;;  %s96_s22 = sadd.s32 1, %s972_s17 }
   0x7   : > { %s93_s23 = ssub.s32 %s976_s18, %s1036_s21  ;;  %p106_p0 = scmp.ne.s32.totalorder %s972_s17, %s968_s16 }
   0x8   : > { %p94_p1 = scmp.eq.s32.totalorder %s93_s23, 0  ;;  %p107_p2 = scmp.eq.s32.totalorder %s1032_s19, 1 }
   0x9   : > { %p112_p3 = scmp.ne.s32.totalorder %s968_s16, %s964_s15  ;;  %p113_p4 = scmp.eq.s32.totalorder %s730_s20, 1 }
   0xa   : > { %s1047_s24 = scalar_select %p94_p1, %s972_s17, %s96_s22  }
   0xb   : > { %p1049_p5 = por %p107_p2, %p106_p0  ;;  %p1053_p6 = por %p113_p4, %p112_p3 }
   0xc   : > { %p733_p7 = scmp.ge.s32.totalorder %s976_s18, 1  ;;  %p171_p8 = scmp.lt.s32.totalorder %s976_s18, 3 }
   0xe   : > { %p172_p9 = pnand %p733_p7, %p171_p8 }
   0xf   : > { %p202_p10 = scmp.lt.s32.totalorder (!%p172_p9), %s1032_s19, 1  ;;  %v246_v0 = vlaneseq (!%p172_p9)  ;;  %v978_v1 = vmov (!%p172_p9), 1983009808   ;;  %v396_v3 = vld [vmem:[%s1418_s1] sm:$0xff] (!%p172_p9)  ;;  %v397_v4 = vld [vmem:[%s1418_s1 + $0x8] sm:$0xff] (!%p172_p9)  ;;  %v1070_v6 = vld [vmem:[%s1418_s1 + $0x10] sm:$0xff] (!%p172_p9) }
  0x10   : > { %175 = sbr.rel (%p172_p9) target bundleno = 407 (0x197), region = 32  ;;  %v244_v2 = vunpack.c.l.s4 (!%p172_p9), %v978_v1  ;;  %v1075_v7 = vld [vmem:[%s1418_s1 + $0x18] sm:$0xff] (!%p172_p9)  ;;  %v505_v9 = vld [vmem:[%s1419_s2] sm:$0xff] (!%p172_p9)  ;;  %v506_v10 = vld [vmem:[%s1419_s2 + $0x8] sm:$0xff] (!%p172_p9)  ;;  %vm232_vm0 = vcmask (!%p172_p9), 1046528   ;;  %v979_v12 = vmov (!%p172_p9), 0.0|0.0   ;;  %v759_v13 = vpack.c.bf16 (!%p172_p9), %v397_v4, %v396_v3 }
  0x11   : > { %v247_v5 = vshrl.u32 (!%p172_p9), %v246_v0, 7  ;;  %v1086_v11 = vld [vmem:[%s1418_s1 + $0x20] sm:$0xff] (!%p172_p9)  ;;  %758 = vmatprep.subr.bf16.mxu0 (!%p172_p9), %v979_v12  ;;  %794 = vmatprep.subr.bf16.mxu1 (!%p172_p9), %v979_v12  ;;  %v795_v14 = vpack.c.bf16 (!%p172_p9), %v506_v10, %v505_v9  ;;  %v1093_v15 = vld [vmem:[%s1418_s1 + $0x28] sm:$0xff] (!%p172_p9)  ;;  %v507_v16 = vld [vmem:[%s1419_s2 + $0x10] sm:$0xff] (!%p172_p9)  ;;  %vm239_vm1 = vcmask (!%p172_p9), 522240   ;;  %vm209_vm2 = vcmask (!%p172_p9), 516096  }
  0x12   : > { %v245_v8 = vunpack.c.0.s8 (!%p172_p9), %v244_v2  ;;  %v508_v17 = vld [vmem:[%s1419_s2 + $0x18] sm:$0xff] (!%p172_p9)  ;;  %v1109_v20 = vld [vmem:[%s1418_s1 + $0x30] sm:$0xff] (!%p172_p9)  ;;  %v1119_v22 = vld [vmem:[%s1419_s2 + $0x20] sm:$0xff] (!%p172_p9)  ;;  %vm219_vm3 = vcmask (!%p172_p9), 523265   ;;  %vm371_vm4 = vcmask (!%p172_p9), 1041409   ;;  %760 = vmatpush1.bf16.msra.mxu0 (!%p172_p9), %v759_v13  ;;  %v762_v25 = vpack.c.bf16 (!%p172_p9), %v1075_v7, %v1070_v6  ;;  %s980_s23 = smov (!%p172_p9), 64  }
  0x13   : > { %v1104_v19 = vsub.s32 (!%p172_p9), 0, %v247_v5  ;;  %v1114_v21 = vld [vmem:[%s1418_s1 + $0x38] sm:$0xff] (!%p172_p9)  ;;  %796 = vmatpush1.bf16.msra.mxu1 (!%p172_p9), %v795_v14  ;;  %v765_v26 = vpack.c.bf16 (!%p172_p9), %v1093_v15, %v1086_v11  ;;  %v798_v27 = vpack.c.bf16 (!%p172_p9), %v508_v17, %v507_v16  ;;  %v510_v28 = vld [vmem:[%s1419_s2 + $0x28] sm:$0xff] (!%p172_p9)  ;;  %vm352_vm5 = vcmask (!%p172_p9), 1042434   ;;  %761 = vmatprep.subr.bf16.mxu0 (!%p172_p9), %v979_v12  ;;  %v1143_v33 = vld [vmem:[%s1418_s1 + $0x40] sm:$0xff] (!%p172_p9)  ;;  %s1332_s28 = sand.u32 (!%p172_p9), 1, %s968_s16  }
  0x14   : > { %v248_v18 = vsub.s32 (!%p172_p9), %v245_v8, %v247_v5  ;;  %v1148_v34 = vld [vmem:[%s1418_s1 + $0x48] sm:$0xff] (!%p172_p9)  ;;  %v981_v35 = vmov (!%p172_p9), 0.0   ;;  %vm354_vm6 = vcmask (!%p172_p9), 1043459   ;;  %797 = vmatprep.subr.bf16.mxu1 (!%p172_p9), %v979_v12  ;;  %v768_v38 = vpack.c.bf16 (!%p172_p9), %v1114_v21, %v1109_v20  ;;  %v511_v52 = vld [vmem:[%s1419_s2 + $0x30] sm:$0xff] (!%p172_p9)  ;;  %v512_v53 = vld [vmem:[%s1419_s2 + $0x38] sm:$0xff] (!%p172_p9)  ;;  %s734_s29 = sshll.u32 (!%p172_p9), %s1332_s28, 4 }
  0x15   : > { %210 = vst.msk [vmem:[#allocation2] sm:$0x1] (!%p172_p9), %vm209_vm2, %v981_v35  ;;  %241 = vst.msk [vmem:[#allocation2 + $0x1f] sm:$0x1] (!%p172_p9), %vm209_vm2, %v981_v35  ;;  %v801_v39 = vpack.c.bf16 (!%p172_p9), %v510_v28, %v1119_v22  ;;  %vm356_vm7 = vcmask (!%p172_p9), 1044484   ;;  %v771_v43 = vpack.c.bf16 (!%p172_p9), %v1148_v34, %v1143_v33  ;;  %vm358_vm8 = vcmask (!%p172_p9), 1045509  }
  0x16   : > { %391 = vst.msk [vmem:[#allocation3 + $0xf] sm:$0x1] (!%p172_p9), %vm209_vm2, %v981_v35  ;;  %316 = vst.msk [vmem:[#allocation3] sm:$0x1] (!%p172_p9), %vm209_vm2, %v981_v35  ;;  %763 = vmatpush1.bf16.msra.mxu0 (!%p172_p9), %v762_v25  ;;  %vm360_vm9 = vcmask (!%p172_p9), 1046534   ;;  %v804_v1 = vpack.c.bf16 (!%p172_p9), %v512_v53, %v511_v52  ;;  %v513_v15 = vld [vmem:[%s1419_s2 + $0x40] sm:$0xff] (!%p172_p9) }
  0x17   : > { %s203_s5 = scalar_select %p202_p10, %s1032_s19, 1  ;;  %799 = vmatpush1.bf16.msra.mxu1 %v798_v27  ;;  %764 = vmatprep.subr.bf16.mxu0 %v979_v12  ;;  %v514_v16 = vld [vmem:[%s1419_s2 + $0x48] sm:$0xff]  ;;  %vm362_vm10 = vcmask 1047559   ;;  %v406_v21 = vld [vmem:[%s1418_s1 + $0x50] sm:$0xff]  ;;  %v407_v22 = vld [vmem:[%s1418_s1 + $0x58] sm:$0xff]  ;;  %vm221_vm11 = vcmask 523264  }
  0x18   : > { %800 = vmatprep.subr.bf16.mxu1 %v979_v12  ;;  %v409_v33 = vld [vmem:[%s1418_s1 + $0x68] sm:$0xff]  ;;  %vm213_vm12 = vcmask 1040384   ;;  %v519_v52 = vld [vmem:[%s1419_s2 + $0x70] sm:$0xff]  ;;  %v520_v53 = vld [vmem:[%s1419_s2 + $0x78] sm:$0xff]  ;;  %vm229_vm13 = vcmask 1048064   ;;  %s194_s30 = scalar_lea.vmem [#allocation4], %s734_s29 }
  0x19   : > { %s756_s22 = sshll.u32 %s203_s5, 4  ;;  %s623_s6 = sshll.u32 %s194_s30, 4  ;;  %s1337_s6 = int_to_ptr.vmem [resolvable:$true] %s623_s6 }
  0x1a   : > { %s206_s8 = scalar_lea.vmem %s1417_s0, %s756_s22  ;;  %766 = vmatpush1.bf16.msra.mxu0 %v765_v26  ;;  %s757_s5 = sshll.u32 %s1032_s19, 8 }
  0x1b   : > { %v1121_v23 = vld [vmem:[%s206_s8] sm:$0xff]  ;;  %v1123_v24 = vld [vmem:[%s206_s8 + $0x8] sm:$0xff]  ;;  %802 = vmatpush1.bf16.msra.mxu1 %v801_v39  ;;  %767 = vmatprep.subr.bf16.mxu0 %v979_v12  ;;  %s1342_s9 = scalar_lea.hbm %s1420_s3, %s757_s5  ;;  %s605_s10 = scalar_lea.sflag [#allocation5], %s1332_s28 }
  0x1c   : > { %223 = vrot.lane.b32.xlu0 %v1121_v23, %s980_s23  ;;  %v233_v29 = vrot.slane %v1121_v23, 1  ;;  %v242_v30 = vcombine.high %v1121_v23, %v1121_v23  ;;  %v249_v31 = vrot.slane %v1121_v23, %v248_v18  ;;  %v234_v32 = vrot.slane %v1123_v24, 1  ;;  %803 = vmatprep.subr.bf16.mxu1 %v979_v12  ;;  %s882_s11 = scalar_lea.vmem %s1337_s6, 256  ;;  %s982_s12 = smov [#allocation4]  }
  0x1d   : > { %v259_v36 = vcombine.high %v1123_v24, %v1123_v24  ;;  %v266_v37 = vrot.slane %v1123_v24, %v248_v18  ;;  %v214_v5 = vrot.slane %v1121_v23, 7  ;;  %p883_p11 = scmp.ne.s32.totalorder %s1337_s6, %s882_s11  ;;  %s886_s13 = sshll.u32 %s982_s12, 4  ;;  %s887_s13 = int_to_ptr.vmem [resolvable:$false] %s886_s13 }
  0x1e   : > { %v256_v40 = vrot.slane %v242_v30, %v248_v18  ;;  %v257_v41 = vcombine.high %v249_v31, %v249_v31  ;;  %v738_v42 = vrot.slane %v249_v31, 9  ;;  %240 = vst.msk [vmem:[#allocation2 + $0x18] sm:$0x7f] %vm239_vm1, %v234_v32  ;;  %v1165_v44 = vsel %vm232_vm0, %v233_v29, %v234_v32  ;;  %769 = vmatpush1.bf16.msra.mxu0 %v768_v38  ;;  %v516_v32 = vld [vmem:[%s1419_s2 + $0x58] sm:$0xff]  ;;  %s888_s14 = scalar_lea.vmem %s887_s13, 512  ;;  %p889_p0 = scmp.lt.s32.totalorder %s1337_s6, %s887_s13 }
  0x1f   : > { %v273_v45 = vrot.slane %v259_v36, %v248_v18  ;;  %v274_v46 = vcombine.high %v266_v37, %v266_v37  ;;  %v742_v47 = vrot.slane %v266_v37, 9  ;;  %220 = vst.msk [vmem:[#allocation2] sm:$0xfe] %vm219_vm3, %v214_v5  ;;  %805 = vmatpush1.bf16.msra.mxu1 %v804_v1  ;;  %770 = vmatprep.subr.bf16.mxu0 %v979_v12  ;;  %v523_v1 = vld [vmem:[%s1419_s2 + $0x90] sm:$0xff]  ;;  %p884_p12 = pnand %p883_p11, %p1049_p5  ;;  %p890_p1 = scmp.lt.s32.totalorder %s888_s14, %s882_s11 }
  0x20   : > { %v739_v48 = vrot.slane %v257_v41, 9  ;;  %v740_v49 = vrot.slane %v256_v40, 9  ;;  %v308_v50 = vadd.f32 %v738_v42, %v249_v31  ;;  %225 = vrot.lane.b32.xlu0 %v1123_v24, %s980_s23  ;;  %v258_v51 = vcombine.high %v256_v40, %v256_v40  ;;  %806 = vmatprep.subr.bf16.mxu1 %v979_v12  ;;  %v515_v31 = vld [vmem:[%s1419_s2 + $0x50] sm:$0xff]  ;;  %238 = vst.msk [vmem:[#allocation2 + $0x8] sm:$0xff] %vm221_vm11, %v1165_v44  ;;  %v408_v42 = vld [vmem:[%s1418_s1 + $0x60] sm:$0xff] }
  0x21   : > { %v275_v54 = vcombine.high %v273_v45, %v273_v45  ;;  %v743_v55 = vrot.slane %v274_v46, 9  ;;  %v744_v56 = vrot.slane %v273_v45, 9  ;;  %v312_v57 = vadd.f32 %v742_v47, %v266_v37  ;;  %p885_p13 = pneg %p884_p12  ;;  %p891_p2 = por %p890_p1, %p889_p0 }
  0x22   : > { %v309_v58 = vadd.f32 %v739_v48, %v257_v41  ;;  %v741_v59 = vrot.slane %v258_v51, 9  ;;  %v310_v60 = vadd.f32 %v740_v49, %v256_v40  ;;  %v327_v61 = vrot.slane %v308_v50, %v1104_v19  ;;  %772 = vmatpush1.bf16.msra.mxu0 %v771_v43  ;;  %v517_v43 = vld [vmem:[%s1419_s2 + $0x60] sm:$0xff]  ;;  %v410_v48 = vld [vmem:[%s1418_s1 + $0x70] sm:$0xff]  ;;  %v411_v49 = vld [vmem:[%s1418_s1 + $0x78] sm:$0xff] }
  0x23   : > { %v745_v62 = vrot.slane %v275_v54, 9  ;;  %v313_v63 = vadd.f32 %v743_v55, %v274_v46  ;;  %v314_v0 = vadd.f32 %v744_v56, %v273_v45  ;;  %v343_v7 = vrot.slane %v312_v57, %v1104_v19  ;;  %773 = vmatprep.subr.bf16.mxu0 %v979_v12  ;;  %v412_v55 = vld [vmem:[%s1418_s1 + $0x80] sm:$0xff]  ;;  %v413_v56 = vld [vmem:[%s1418_s1 + $0x88] sm:$0xff]  ;;  %p892_p3 = pnand %p891_p2, %p885_p13 }
  0x24   : > { %v311_v2 = vadd.f32 %v741_v59, %v258_v51  ;;  %v331_v3 = vrot.slane %v309_v58, %v1104_v19  ;;  %v335_v4 = vrot.slane %v310_v60, %v1104_v19  ;;  %v807_v30 = vpack.c.bf16 %v514_v16, %v513_v15  ;;  %v521_v58 = vld [vmem:[%s1419_s2 + $0x80] sm:$0xff]  ;;  %v522_v59 = vld [vmem:[%s1419_s2 + $0x88] sm:$0xff]  ;;  %v528_v15 = vld [vmem:[%s1419_s2 + $0xb8] sm:$0xff] }
  0x25   : > { %v315_v6 = vadd.f32 %v745_v62, %v275_v54  ;;  %v347_v8 = vrot.slane %v313_v63, %v1104_v19  ;;  %v351_v9 = vrot.slane %v314_v0, %v1104_v19  ;;  %v774_v38 = vpack.c.bf16 %v407_v22, %v406_v21  ;;  %v414_v62 = vld [vmem:[%s1418_s1 + $0x90] sm:$0xff]  ;;  %v415_v0 = vld [vmem:[%s1418_s1 + $0x98] sm:$0xff] }
  0x26   : > { %v339_v10 = vrot.slane %v311_v2, %v1104_v19  ;;  %v353_v11 = vsel %vm352_vm5, %v331_v3, %v327_v61  ;;  %v372_v13 = vsel %vm371_vm4, %v331_v3, %v327_v61  ;;  %v383_v14 = vsel %vm371_vm4, %v335_v4, %v331_v3  ;;  %808 = vmatpush1.bf16.msra.mxu1 %v807_v30  ;;  %v524_v2 = vld [vmem:[%s1419_s2 + $0x98] sm:$0xff] }
  0x27   : > { %v355_v17 = vsel %vm354_vm6, %v335_v4, %v353_v11  ;;  %v370_v18 = vrot.slane %v315_v6, %v1104_v19  ;;  %v373_v20 = vsel %vm352_vm5, %v335_v4, %v372_v13  ;;  %v215_v44 = vrot.slane %v1123_v24, 7  ;;  %809 = vmatprep.subr.bf16.mxu1 %v979_v12  ;;  %v518_v24 = vld [vmem:[%s1419_s2 + $0x68] sm:$0xff]  ;;  %775 = vmatpush1.bf16.msra.mxu0 %v774_v38  ;;  %v416_v4 = vld [vmem:[%s1418_s1 + $0xa0] sm:$0xff]  ;;  %v419_v13 = vld [vmem:[%s1418_s1 + $0xb8] sm:$0xff] }
  0x28   : > { %v374_v25 = vsel %vm354_vm6, %v339_v10, %v373_v20  ;;  %v384_v26 = vsel %vm352_vm5, %v339_v10, %v383_v14  ;;  %v357_v27 = vsel %vm356_vm7, %v339_v10, %v355_v17  ;;  %v810_v34 = vpack.c.bf16 %v516_v32, %v515_v31  ;;  %776 = vmatprep.subr.bf16.mxu0 %v979_v12  ;;  %v393_v54 = vld [vmem:[#allocation2 + $0x8] sm:$0xff]  ;;  %v418_v10 = vld [vmem:[%s1418_s1 + $0xb0] sm:$0xff]  ;;  %v395_v21 = vld [vmem:[#allocation2 + $0x18] sm:$0xff] }
  0x29   : > { %v375_v19 = vsel %vm356_vm7, %v343_v7, %v374_v25  ;;  %v385_v28 = vsel %vm354_vm6, %v343_v7, %v384_v26  ;;  %v359_v29 = vsel %vm358_vm8, %v343_v7, %v357_v27  ;;  %v777_v47 = vpack.c.bf16 %v409_v33, %v408_v42  ;;  %746 = vmatprep.mubr.msk.f32.mxu0 %vm221_vm11, %v393_v54  ;;  %v417_v6 = vld [vmem:[%s1418_s1 + $0xa8] sm:$0xff]  ;;  %v525_v7 = vld [vmem:[%s1419_s2 + $0xa0] sm:$0xff]  ;;  %v527_v14 = vld [vmem:[%s1419_s2 + $0xb0] sm:$0xff] }
  0x2a   : > { %v376_v35 = vsel %vm358_vm8, %v347_v8, %v375_v19  ;;  %v386_v36 = vsel %vm356_vm7, %v347_v8, %v385_v28  ;;  %v361_v37 = vsel %vm360_vm9, %v347_v8, %v359_v29  ;;  %811 = vmatpush1.bf16.msra.mxu1 %v810_v34  ;;  %v813_v50 = vpack.c.bf16 %v518_v24, %v517_v43  ;;  %v526_v8 = vld [vmem:[%s1419_s2 + $0xa8] sm:$0xff] }
  0x2b   : > { %v377_v39 = vsel %vm360_vm9, %v351_v9, %v376_v35  ;;  %v387_v40 = vsel %vm358_vm8, %v351_v9, %v386_v36  ;;  %v363_v41 = vsel %vm362_vm10, %v351_v9, %v361_v37  ;;  %v216_v51 = vsel %vm213_vm12, %v214_v5, %v215_v44  ;;  %812 = vmatprep.subr.bf16.mxu1 %v979_v12 }
  0x2c   : > { %v378_v45 = vsel %vm362_vm10, %v370_v18, %v377_v39  ;;  %v388_v46 = vsel %vm360_vm9, %v370_v18, %v387_v40  ;;  %365 = vst.msk [vmem:[#allocation3] sm:$0xfe] %vm219_vm3, %v363_v41  ;;  %778 = vmatpush1.bf16.msra.mxu0 %v777_v47  ;;  %v780_v23 = vpack.c.bf16 %v411_v49, %v410_v48 }
  0x2d   : > { %390 = vst.msk [vmem:[#allocation3 + $0x8] sm:$0x7f] %vm239_vm1, %v388_v46  ;;  %379 = vrot.lane.b32.xlu1 %v378_v45, %s980_s23  ;;  %v816_v57 = vpack.c.bf16 %v520_v53, %v519_v52  ;;  %779 = vmatprep.subr.bf16.mxu0 %v979_v12  ;;  %v783_v61 = vpack.c.bf16 %v413_v56, %v412_v55 }
  0x2e   : > { %222 = vst.msk [vmem:[#allocation2 + $0x10] sm:$0xff] %vm221_vm11, %v216_v51  ;;  %814 = vmatpush1.bf16.msra.mxu1 %v813_v50  ;;  %v819_v63 = vpack.c.bf16 %v522_v59, %v521_v58  ;;  %v786_v3 = vpack.c.bf16 %v415_v0, %v414_v62  ;;  %v822_v5 = vpack.c.bf16 %v524_v2, %v523_v1 }
  0x2f   : > { %815 = vmatprep.subr.bf16.mxu1 %v979_v12  ;;  %v789_v9 = vpack.c.bf16 %v417_v6, %v416_v4  ;;  %v825_v11 = vpack.c.bf16 %v526_v8, %v525_v7  ;;  %v792_v16 = vpack.c.bf16 %v419_v13, %v418_v10  ;;  %v828_v17 = vpack.c.bf16 %v528_v15, %v527_v14 }
  0x30   : > { %781 = vmatpush1.bf16.msra.mxu0 %v780_v23 }
  0x31   : > { %782 = vmatprep.subr.bf16.mxu0 %v979_v12 }
  0x32   : > { %817 = vmatpush1.bf16.msra.mxu1 %v816_v57 }
  0x33   : > { %818 = vmatprep.subr.bf16.mxu1 %v979_v12 }
  0x34   : > { %v504_v60 = vld [vmem:[#allocation3 + $0x8] sm:$0xff]  ;;  %784 = vmatpush1.bf16.msra.mxu0 %v783_v61 }
  0x35   : > { %748 = vmatprep.mubr.msk.f32.mxu1 %vm221_vm11, %v504_v60  ;;  %785 = vmatprep.subr.bf16.mxu0 %v979_v12 }
  0x36   : > { %820 = vmatpush1.bf16.msra.mxu1 %v819_v63 }
  0x37   : > { %821 = vmatprep.subr.bf16.mxu1 %v979_v12 }
  0x38   : > { %787 = vmatpush1.bf16.msra.mxu0 %v786_v3 }
  0x39   : > { %788 = vmatprep.subr.bf16.mxu0 %v979_v12 }
  0x3a   : > { %823 = vmatpush1.bf16.msra.mxu1 %v822_v5 }
  0x3b   : > { %824 = vmatprep.subr.bf16.mxu1 %v979_v12 }
  0x3c   : > { %790 = vmatpush1.bf16.msra.mxu0 %v789_v9 }
  0x3d   : > { %791 = vmatprep.subr.bf16.mxu0 %v979_v12 }
  0x3e   : > { %826 = vmatpush1.bf16.msra.mxu1 %v825_v11 }
  0x3f   : > { %827 = vmatprep.subr.bf16.mxu1 %v979_v12 }
  0x40   : > { %793 = vmatpush1.bf16.msra.mxu0 %v792_v16 }
  0x42   : > { %829 = vmatpush1.bf16.msra.mxu1 %v828_v17 }
  0x8e   : > { %v224_v18 = vpop.permute.xlu0 %223 }
  0x8f   : > { %230 = vst.msk [vmem:[#allocation2] sm:$0xff] %vm229_vm13, %v224_v18 }
  0x92   : > { %v226_v20 = vpop.permute.xlu0 %225 }
  0x93   : > { %231 = vst.msk [vmem:[#allocation2 + $0x10] sm:$0xff] %vm229_vm13, %v226_v20 }
  0x96   : > { %v392_v22 = vld [vmem:[#allocation2] sm:$0xff] }
  0x97   : > { %491 = vmatmul.mubr.f32.vlgmr.msra.gmra.mrb[0].mxu0 %v392_v22 }
  0x98   : > { %747 = vmatprep.mubr.msk.f32.mxu0 %vm221_vm11, %v395_v21 }
  0x9a   : > { %v394_v25 = vld [vmem:[#allocation2 + $0x10] sm:$0xff] }
  0x9b   : > { %496 = vmatmul.mubr.f32.gmra.mrb[2].mxu0 %v394_v25 }
  0x9f   : > { %v380_v26 = vpop.permute.xlu1 %379 }
  0xa0   : > { %382 = vst.msk [vmem:[#allocation3] sm:$0xff] %vm229_vm13, %v380_v26 }
  0xa7   : > { %v503_v27 = vld [vmem:[#allocation3] sm:$0xff] }
  0xa8   : > { %597 = vmatmul.mubr.f32.vlgmr.msra.gmra.mrb[0].mxu1 %v503_v27 }
 0x16a   : > { %v492_v12 = vpop.f32.mrb[0].mxu0 }
 0x16b   : > { %501 = vst.msk [vmem:[%s194_s30] sm:$0xff] %vm221_vm11, %v492_v12  ;;  %v494_v19 = vpop.f32.mrb[1].mxu0 }
 0x16e   : > { %v497_v28 = vpop.f32.mrb[2].mxu0 }
 0x16f   : > { %502 = vst.msk [vmem:[%s194_s30 + $0x8] sm:$0xff] %vm221_vm11, %v497_v28  ;;  %v499_v29 = vpop.f32.mrb[3].mxu0 }
 0x170   : > { %895 = shalt.err (!%p892_p3)
}
 0x171   : > { %s896_s20 = scalar_lea.hbm %s1342_s9, 256  ;;  %s900_s27 = scalar_lea.hbm %s1420_s3, 512 }
 0x172   : > { %p897_p4 = scmp.ne.s32.totalorder %s1342_s9, %s896_s20  ;;  %p901_p9 = scmp.lt.u32.totalorder %s1342_s9, %s1420_s3 }
 0x173   : > { %p902_p10 = scmp.lt.u32.totalorder %s900_s27, %s896_s20  ;;  %p904_p12 = scmp.lt.u32.totalorder %s896_s20, %s1342_s9 }
 0x174   : > { %p898_p7 = pnand %p897_p4, %p1049_p5 }
 0x175   : > { %p903_p11 = por %p902_p10, %p901_p9 }
 0x176   : > { %p899_p8 = pneg %p898_p7 }
 0x177   : > { %p905_p13 = por %p904_p12, %p903_p11 }
 0x179   : > { %p906_p0 = pnand %p905_p13, %p899_p8 }
 0x17b   : > { %909 = shalt.err (!%p906_p0)
}
 0x17c   : > { %s983_s5 = smov 128   ;;  %s984_s7 = smov 8   ;;  %vm602_vm14 = vcmask 261120   ;;  %v598_v30 = vpop.f32.mrb[0].mxu1 }
 0x17d   : > { %830 = dma.vmem_to_hbm [thread:$0]  (%p1049_p5), %s1337_s6, 256, %s1342_s9, %s605_s10, %s983_s5, %s983_s5, %s984_s7   ;;  %v600_v31 = vpop.f32.mrb[1].mxu1 }
 0x17e   : > { %s735_s8 = sshll.u32 %s1332_s28, 3  ;;  %s753_s11 = sshll.u32 %s1032_s19, 7 }
 0x17f   : > { %s201_s12 = scalar_lea.vmem [#allocation6], %s735_s8  ;;  %s1374_s22 = scalar_lea.hbm %s1421_s4, %s753_s11 }
 0x180   : > { %s639_s13 = sshll.u32 %s201_s12, 4  ;;  %603 = vst.msk [vmem:[%s201_s12] sm:$0xff] %vm602_vm14, %v598_v30  ;;  %s610_s23 = scalar_lea.sflag [#allocation7], %s1332_s28  ;;  %s1376_s13 = int_to_ptr.vmem [resolvable:$true] %s639_s13 }
 0x181   : > { %s910_s6 = scalar_lea.vmem %s1376_s13, 128  ;;  %s985_s19 = smov [#allocation6]  }
 0x182   : > { %p911_p1 = scmp.ne.s32.totalorder %s1376_s13, %s910_s6  ;;  %s914_s9 = sshll.u32 %s985_s19, 4  ;;  %s915_s9 = int_to_ptr.vmem [resolvable:$false] %s914_s9 }
 0x183   : > { %s916_s10 = scalar_lea.vmem %s915_s9, 256  ;;  %p917_p4 = scmp.lt.s32.totalorder %s1376_s13, %s915_s9 }
 0x184   : > { %p912_p2 = pnand %p911_p1, %p1049_p5  ;;  %p918_p7 = scmp.lt.s32.totalorder %s916_s10, %s910_s6 }
 0x186   : > { %p913_p3 = pneg %p912_p2  ;;  %p919_p8 = por %p918_p7, %p917_p4 }
 0x188   : > { %p920_p9 = pnand %p919_p8, %p913_p3 }
 0x18a   : > { %923 = shalt.err (!%p920_p9)
}
 0x18b   : > { %s924_s28 = scalar_lea.hbm %s1374_s22, 128  ;;  %s928_s30 = scalar_lea.hbm %s1421_s4, 256 }
 0x18c   : > { %p925_p10 = scmp.ne.s32.totalorder %s1374_s22, %s924_s28  ;;  %p929_p13 = scmp.lt.u32.totalorder %s1374_s22, %s1421_s4 }
 0x18d   : > { %p930_p0 = scmp.lt.u32.totalorder %s928_s30, %s924_s28  ;;  %p932_p2 = scmp.lt.u32.totalorder %s924_s28, %s1374_s22 }
 0x18e   : > { %p926_p11 = pnand %p925_p10, %p1049_p5 }
 0x18f   : > { %p931_p1 = por %p930_p0, %p929_p13 }
 0x190   : > { %p927_p12 = pneg %p926_p11 }
 0x191   : > { %p933_p3 = por %p932_p2, %p931_p1 }
 0x193   : > { %p934_p4 = pnand %p933_p3, %p927_p12 }
 0x195   : > { %937 = shalt.err (!%p934_p4)
}
 0x196   : > { %831 = dma.vmem_to_hbm [thread:$0]  (%p1049_p5), %s1376_s13, 128, %s1374_s22, %s610_s23  }
 0x197 PF: > { %p841_p7 = scmp.ge.s32.totalorder %s976_s18, 2  ;;  %s651_s8 = sand.u32 1, %s964_s15  }
 0x198   : > { %s652_s11 = scalar_lea.sflag [#allocation5], %s651_s8 }
 0x199   : > { %p835_p8 = pnand %p841_p7, %p1053_p6 }
 0x19b   : > { %955 = dma.done.wait (!%p835_p8), %s652_s11, 256  }
 0x19c   : > { %957 = vsyncadd (!%p835_p8), %s652_s11, 4294967040  ;;  %s661_s12 = scalar_lea.sflag [#allocation7], %s651_s8 }
 0x19d   : > { %959 = dma.done.wait (!%p835_p8), %s661_s12, 128  }
 0x19e   : > { %961 = vsyncadd (!%p835_p8), %s661_s12, 4294967168  ;;  %p18_p5 = scmp.ge.s32.totalorder %s1036_s21, 4   ;;  %s1424_s15 = smov %s968_s16 }
 0x19f   : > { %s1425_s16 = smov %s972_s17  ;;  %s1426_s17 = smov %s1047_s24 }
 0x1a0   : > { %s1427_s18 = smov %s1036_s21  ;;  %20 = sbr.rel (!%p18_p5) target bundleno = 5 (0x5), region = 84 }
 0x1a7   :  { %666 = vsyncpa [#allocation5], 1 }
 0x1a8   :  { %668 = vsyncpa [#allocation5 + $0x1], 1 }
 0x1a9   :  { %669 = vsyncpa [#allocation7], 1 }
 0x1aa   :  { %671 = vsyncpa [#allocation7 + $0x1], 1 }

</bundles_post_ra>
